<compile_context>
chip_gen: v5e
topology: v5e:2x2
jax: 0.10.0
libtpu: 0.0.40
codegen_flags: <defaults>
</compile_context>

<pallas_src>
import jax
import jax.numpy as jnp
from jax.experimental import pallas as pl
from jax.experimental.pallas import tpu as pltpu


def _negrelu_kernel(x_ref, o_ref):
    # -relu(-x) == min(x, 0).  A single VPU min per vreg; differs from the
    # double-negate form only in the sign of zero at x == +0.0 (benign).
    o_ref[...] = jnp.minimum(x_ref[...], 0)


_MIN_BLOCK_BYTES = 256 * 1024       # amortize ~0.35 us per grid step
_SMALL_INPUT_BYTES = 256 * 1024     # below this, let XLA fuse jnp.minimum


def _block_params():
    """(target_block_bytes, min_grid_steps) per TPU generation."""
    try:
        kind = jax.devices()[0].device_kind.lower()
    except Exception:
        kind = ""
    if ("v6" in kind) or ("v7" in kind) or ("7x" in kind):
        # v6e/v7x: 4 MiB blocks -> 16 MiB double-buffered VMEM; >=8 steps so
        # v7x's two TensorCores both get work on the "parallel" grid axis.
        return 4 * 1024 * 1024, 8
    # v5e (16 MiB scoped-VMEM default) and anything unrecognized: 2 MiB blocks
    # (8 MiB double-buffered), already on the measured roofline plateau.
    return 2 * 1024 * 1024, 4


def _choose_lanes(n: int) -> int:
    """Widest lane-aligned (multiple-of-128) divisor of n up to 1024; else the
    largest divisor of n that is <= 1024 (masked stores, but no extra passes)."""
    for cand in (1024, 896, 768, 640, 512, 384, 256, 128):
        if n % cand == 0:
            return cand
    best, d = 1, 1
    while d * d <= n:
        if n % d == 0:
            lo, hi = d, n // d
            if lo <= 1024 and lo > best:
                best = lo
            if hi <= 1024 and hi > best:
                best = hi
        d += 1
    return best


def _round_up(x: int, m: int) -> int:
    return -(-x // m) * m


def negrelu(x: jax.Array, *, min_pallas_bytes: int = _SMALL_INPUT_BYTES) -> jax.Array:
    """NegReLU: y = -relu(-x) == min(x, 0), elementwise, any shape (e.g. NCHW)."""
    orig_shape = x.shape
    dtype = x.dtype
    n = x.size
    itemsize = jnp.dtype(dtype).itemsize
    nbytes = n * itemsize

    if n == 0:
        return x
    # Tiny tensors: kernel-launch + per-step overhead dwarfs the HBM traffic.
    if nbytes < min_pallas_bytes:
        return jnp.minimum(x, 0).astype(dtype)

    lanes = _choose_lanes(n)
    if lanes < 64:
        # Pathological (prime-ish) size: a narrow slab would waste most of each
        # vreg on masked lanes; plain fused elementwise is the better fallback.
        return jnp.minimum(x, 0).astype(dtype)

    rows = n // lanes
    row_bytes = lanes * itemsize
    target_block_bytes, min_steps = _block_params()

    # dtype-aware sublane granularity (sub-32-bit dtypes pack along sublanes).
    if itemsize >= 4:
        row_align = 8
    elif itemsize == 2:
        row_align = 16
    else:
        row_align = 32

    # Row tiling: capped by the VMEM target, floored at ~256 KiB per step, and
    # aiming for >= min_steps grid steps so the pipeline (and both v7x TCs) stay busy.
    cap_rows = max(row_align, (target_block_bytes // row_bytes) // row_align * row_align)
    floor_rows = _round_up(max(1, pl.cdiv(_MIN_BLOCK_BYTES, row_bytes)), row_align)
    want_rows = _round_up(pl.cdiv(rows, min_steps), row_align)
    tile_rows = min(cap_rows, max(floor_rows, want_rows))
    if tile_rows >= rows:
        tile_rows = rows  # full extent along rows is always a legal block shape
    grid = (pl.cdiv(rows, tile_rows),)  # partial last block handled by Pallas masking

    x2d = jnp.ravel(x).reshape(rows, lanes)

    out2d = pl.pallas_call(
        _negrelu_kernel,
        out_shape=jax.ShapeDtypeStruct((rows, lanes), dtype),
        grid_spec=pltpu.PrefetchScalarGridSpec(
            num_scalar_prefetch=0,
            grid=grid,
            in_specs=[pl.BlockSpec((tile_rows, lanes), lambda i: (i, 0))],
            out_specs=pl.BlockSpec((tile_rows, lanes), lambda i: (i, 0)),
        ),
        compiler_params=pltpu.CompilerParams(
            dimension_semantics=("parallel",),
        ),
        cost_estimate=pl.CostEstimate(
            flops=n, transcendentals=0, bytes_accessed=2 * nbytes),
    )(x2d)

    return out2d.reshape(orig_shape)


if __name__ == "__main__":
    key = jax.random.PRNGKey(0)

    # NCHW input consistent with the module: batch=2, channels=4, 16x16 spatial.
    x = jax.random.normal(key, (2, 4, 16, 16), dtype=jnp.float32)
    y = jax.block_until_ready(negrelu(x, min_pallas_bytes=0))  # force Pallas path
    y_ref = -jnp.maximum(-x, 0.0)
    assert y.shape == x.shape and y.dtype == x.dtype
    assert jnp.allclose(y, y_ref), "mismatch vs reference (lane-aligned path)"

    # Non-128-divisible flat size -> full-extent (masked) last-dim block, no padding.
    x2 = jax.random.normal(jax.random.PRNGKey(1), (3, 5, 7), dtype=jnp.float32)
    y2 = jax.block_until_ready(negrelu(x2, min_pallas_bytes=0))
    assert jnp.allclose(y2, -jnp.maximum(-x2, 0.0)), "mismatch (masked-lane path)"

    # Medium tensor -> multi-step pipelined grid (>= 4 steps of >= 256 KiB).
    x3 = jax.random.normal(jax.random.PRNGKey(2), (4, 16, 64, 64), dtype=jnp.float32)
    y3 = jax.block_until_ready(negrelu(x3))
    assert jnp.allclose(y3, -jnp.maximum(-x3, 0.0)), "mismatch (multi-step grid)"

    # Default small-input early-out (XLA-fused path).
    y4 = jax.block_until_ready(negrelu(x))
    assert jnp.allclose(y4, y_ref), "mismatch (early-out path)"

    print("KERNEL_OK")
</pallas_src>

<mosaic_0001>
module attributes {stable_mosaic.version = 11 : i64} {
  func.func @_negrelu_kernel(%arg0: i32, %arg1: memref<2x1024xf32, #tpu.memory_space<vmem>>, %arg2: memref<2x1024xf32, #tpu.memory_space<vmem>>) attributes {dimension_semantics = [#tpu.dimension_semantics<parallel>], iteration_bounds = array<i64: 1>, scalar_prefetch = 0 : i64, scratch_operands = 0 : i64, tpu.core_type = #tpu.core_type<tc>, window_params = [{transform_indices = @transform_0, window_bounds = array<i64: 2, 1024>}, {transform_indices = @transform_1, window_bounds = array<i64: 2, 1024>}]} {
    %c0 = arith.constant 0 : index
    %c0_0 = arith.constant 0 : index
    %0 = vector.load %arg1[%c0, %c0_0] : memref<2x1024xf32, #tpu.memory_space<vmem>>, vector<2x1024xf32>
    %cst = arith.constant 0.000000e+00 : f32
    %1 = vector.broadcast %cst : f32 to vector<2x1024xf32>
    %2 = arith.minimumf %0, %1 : vector<2x1024xf32>
    %c0_1 = arith.constant 0 : index
    %c0_2 = arith.constant 0 : index
    %3 = vector.load %arg2[%c0_1, %c0_2] : memref<2x1024xf32, #tpu.memory_space<vmem>>, vector<2x1024xf32>
    tpu.vector_store %arg2[%c0_1, %c0_2], %2 {strides = array<i32>} : memref<2x1024xf32, #tpu.memory_space<vmem>>, vector<2x1024xf32>,
    return
  }
  func.func @transform_0(%arg0: i32) -> (i32, i32) {
    %c0_i32 = arith.constant 0 : i32
    %c0_i32_0 = arith.constant 0 : i32
    return %arg0, %c0_i32 : i32, i32
  }
  func.func @transform_1(%arg0: i32) -> (i32, i32) {
    %c0_i32 = arith.constant 0 : i32
    %c0_i32_0 = arith.constant 0 : i32
    return %arg0, %c0_i32 : i32, i32
  }
}

</mosaic_0001>

<bundles_post_ra>
// kernel: tpu_custom_call.1
= control target key start
LH: loop header
LB: loop body
LE: loop exit
PB: predicated region body
PF: predicated region fallthrough
CT: control target
= control target key end

     0   :  { %6 = vsyncpa [#allocation3], 0  ;;  %s118_s0 = inlined_call_operand.hbm [shape: f32[2,1024], index: 0, kind: input, shape index: {}]   ;;  %s119_s1 = inlined_call_operand.hbm [shape: f32[2,1024], index: 1, kind: output, shape index: {}]  }
   0x1   :  { %7 = vsyncpa [#allocation4], 0  ;;  %s13_s8 = sshll.u32 %s118_s0, 4  ;;  %s100_s9 = smov [#allocation2]   ;;  %s14_s8 = int_to_ptr.hbm [resolvable:$true] %s13_s8 }
   0x2   :  { %s15_s10 = sshll.u32 %s100_s9, 4  ;;  %s16_s10 = int_to_ptr.vmem [resolvable:$true] %s15_s10 }
   0x3   :  { %18 = dma.hbm_to_vmem [thread:$0]  %s14_s8, 256, %s16_s10, [#allocation3]  }
   0x4   :  { %96 = dma.done.wait [#allocation3], 256  }
   0x5   :  { %97 = vsyncadd [#allocation3], 4294967040  ;;  %s101_s11 = smov [#allocation5]   ;;  %s36_s15 = sshll.u32 %s119_s1, 4  ;;  %v23_v0 = vld [vmem:[#allocation2] sm:$0xff]  ;;  %v24_v1 = vld [vmem:[#allocation2 + $0x8] sm:$0xff]  ;;  %s37_s15 = int_to_ptr.hbm [resolvable:$true] %s36_s15 }
   0x6   :  { %s34_s12 = sshll.u32 %s101_s11, 4  ;;  %v25_v2 = vmin.f32 %v23_v0, 0.0  ;;  %v26_v3 = vmin.f32 %v24_v1, 0.0  ;;  %s35_s12 = int_to_ptr.vmem [resolvable:$true] %s34_s12 }
   0x8   :  { %27 = vst [vmem:[#allocation5] sm:$0xff] %v25_v2 }
   0x9   :  { %28 = vst [vmem:[#allocation5 + $0x8] sm:$0xff] %v26_v3 }
   0xa   :  { %39 = dma.vmem_to_hbm [thread:$0]  %s35_s12, 256, %s37_s15, [#allocation4]  }
   0xb   :  { %98 = dma.done.wait [#allocation4], 256  }
   0xc   :  { %99 = vsyncadd [#allocation4], 4294967040 }
   0xd   :  { %44 = vsyncpa [#allocation3], 1 }
   0xe   :  { %45 = vsyncpa [#allocation4], 1 }

</bundles_post_ra>
